<compile_context>
chip_gen: v5e
topology: v5e:2x2
jax: 0.10.0
libtpu: 0.0.40
codegen_flags: <defaults>
</compile_context>

<pallas_src>
import jax
import jax.numpy as jnp
import numpy as np
from jax import lax
from jax.experimental import pallas as pl
from jax.experimental.pallas import tpu as pltpu

EPS = 1e-6        # EPS used by the VN layers
BN_EPS = 1e-5     # nn.BatchNorm1d default eps
NEG_SLOPE = 0.2   # VNLinearLeakyReLU negative_slope
TEMP = 1.0        # CorrelationNet temp


def correlation_net_forward(xyz, params):
    """xyz: [B, C_in, 3, K] (PyTorch layout). Returns [B, out_channel, K]."""
    B, cin, three, K = xyz.shape
    assert three == 3
    bk = B * K

    # Lane-dense working layout: [3, C_in, B*K] (component, channel-sublanes, lanes).
    x = jnp.transpose(xyz, (2, 1, 0, 3)).reshape(3, cin, bk).astype(jnp.float32)

    c0 = params["wf"].shape[0]          # out_channel * 2
    h1 = params["w1"].shape[0]
    h2 = params["w2"].shape[0]
    c_out = params["w3"].shape[0]

    # ---- pack all four weights ([C_out, C_in] layout) into one slab (1 DMA) ----
    wfd = jnp.concatenate([params["wf"], params["wd"]], axis=0)      # [2*c0, cin]
    ws = [wfd, params["w1"], params["w2"], params["w3"]]
    rmax = max(int(w.shape[0]) for w in ws)
    ctot = sum(int(w.shape[1]) for w in ws)
    w_slab = jnp.zeros((rmax, ctot), jnp.float32)
    w_offs = []
    off = 0
    for w in ws:
        w_slab = w_slab.at[: w.shape[0], off: off + w.shape[1]].set(w)
        w_offs.append(off)
        off += int(w.shape[1])

    # ---- pack all seven per-channel vectors into one [sum_C, 1] slab (1 DMA) ----
    vecs = [params["g0"], params["b0"], params["g1"], params["b1"],
            params["g2"], params["b2"], params["bias3"]]
    v_offs = []
    off = 0
    for v in vecs:
        v_offs.append(off)
        off += int(v.shape[0])
    vec_slab = jnp.concatenate(vecs, axis=0).astype(jnp.float32)[:, None]

    def kernel(x_ref, w_ref, vec_ref, out_ref):
        w_all = w_ref[...]
        v_all = vec_ref[...]

        w_fd = w_all[: 2 * c0, w_offs[0]: w_offs[0] + cin]     # [2*c0, cin]
        w1 = w_all[: h1, w_offs[1]: w_offs[1] + c0]            # [h1, c0]
        w2 = w_all[: h2, w_offs[2]: w_offs[2] + h1]            # [h2, h1]
        w3 = w_all[: c_out, w_offs[3]: w_offs[3] + h2]         # [c_out, h2]

        g0 = v_all[v_offs[0]: v_offs[0] + c0]                  # [c0, 1]
        b0 = v_all[v_offs[1]: v_offs[1] + c0]
        g1 = v_all[v_offs[2]: v_offs[2] + h1]
        b1 = v_all[v_offs[3]: v_offs[3] + h1]
        g2 = v_all[v_offs[4]: v_offs[4] + h2]
        b2 = v_all[v_offs[5]: v_offs[5] + h2]
        bias3 = v_all[v_offs[6]: v_offs[6] + c_out]

        def bn_train(v, g, b):
            # BatchNorm1d training-mode batch stats over the B*K (lane) axis.
            mu = jnp.mean(v, axis=-1, keepdims=True)
            var = jnp.mean((v - mu) * (v - mu), axis=-1, keepdims=True)
            return (v - mu) * lax.rsqrt(var + BN_EPS) * g + b

        # --- VNLinearLeakyReLU: fused p/d linear, one MXU dot per 3-vector comp ---
        pd0 = jnp.dot(w_fd, x_ref[0], preferred_element_type=jnp.float32)
        pd1 = jnp.dot(w_fd, x_ref[1], preferred_element_type=jnp.float32)
        pd2 = jnp.dot(w_fd, x_ref[2], preferred_element_type=jnp.float32)
        p0, d0 = pd0[:c0], pd0[c0:]
        p1, d1 = pd1[:c0], pd1[c0:]
        p2, d2 = pd2[:c0], pd2[c0:]

        # VNBatchNorm (dim=4): BatchNorm1d on the 3-vector norm, then rescale p.
        norm = jnp.sqrt(p0 * p0 + p1 * p1 + p2 * p2) + EPS          # [c0, BK]
        scale = bn_train(norm, g0, b0) * pl.reciprocal(norm, approx=True)
        p0, p1, p2 = p0 * scale, p1 * scale, p2 * scale

        # VN leaky ReLU:  x = p - (1 - slope) * [dot<0] * dot/(|d|^2 + EPS) * d
        dotpd = p0 * d0 + p1 * d1 + p2 * d2
        dsq = d0 * d0 + d1 * d1 + d2 * d2
        coef = ((1.0 - NEG_SLOPE) * dotpd) * pl.reciprocal(dsq + EPS, approx=True)
        t = jnp.where(dotpd < 0.0, coef, 0.0)
        x0, x1, x2 = p0 - t * d0, p1 - t * d1, p2 - t * d2

        # scores = ||.||_2 over the 3-vector dim
        s = jnp.sqrt(x0 * x0 + x1 * x1 + x2 * x2)                   # [c0, BK]

        # --- MLP head: 1x1 Conv1d == channel matmul, BN(train)+ReLU on hidden ---
        h = jnp.dot(w1, s, preferred_element_type=jnp.float32)
        h = jnp.maximum(bn_train(h, g1, b1), 0.0)
        h = jnp.dot(w2, h, preferred_element_type=jnp.float32)
        h = jnp.maximum(bn_train(h, g2, b2), 0.0)
        h = jnp.dot(w3, h, preferred_element_type=jnp.float32) + bias3

        # softmax over the channel (sublane) axis, temp = 1
        if TEMP != 1.0:
            h = h * (1.0 / TEMP)
        m = jnp.max(h, axis=0, keepdims=True)
        e = jnp.exp(h - m)
        out_ref[...] = e * pl.reciprocal(jnp.sum(e, axis=0, keepdims=True),
                                         approx=True)

    # TODO(synk): for 3DMatch-scale B*K on v7x (64 MiB VMEM, 2 TCs), tile the BK
    # lane axis with a grid + two-pass (stats, then apply) training-mode BatchNorm
    # and mark the apply pass "parallel"; at these sizes the problem is VMEM-resident.
    out = pl.pallas_call(
        kernel,
        out_shape=jax.ShapeDtypeStruct((c_out, bk), jnp.float32),
        in_specs=[pl.BlockSpec(memory_space=pltpu.MemorySpace.VMEM)] * 3,
        out_specs=pl.BlockSpec(memory_space=pltpu.MemorySpace.VMEM),
        compiler_params=pltpu.CompilerParams(vmem_limit_bytes=64 * 1024 * 1024),
    )(x, w_slab, vec_slab)

    # back to the PyTorch output layout [B, out_channel, K]
    return out.reshape(c_out, B, K).transpose(1, 0, 2)


def correlation_net_ref(xyz, params):
    """Pure-JAX reference with identical semantics (for verification)."""
    B, cin, _, K = xyz.shape
    x = jnp.transpose(xyz, (2, 1, 0, 3)).reshape(3, cin, B * K).astype(jnp.float32)
    p = jnp.einsum('oc,dcn->don', params["wf"], x)
    d = jnp.einsum('oc,dcn->don', params["wd"], x)

    def bn(v, g, b):
        mu = v.mean(axis=-1, keepdims=True)
        var = ((v - mu) ** 2).mean(axis=-1, keepdims=True)
        return (v - mu) / jnp.sqrt(var + BN_EPS) * g[:, None] + b[:, None]

    norm = jnp.sqrt(jnp.sum(p * p, axis=0)) + EPS
    norm_bn = bn(norm, params["g0"], params["b0"])
    p = p / norm[None] * norm_bn[None]
    dot = jnp.sum(p * d, axis=0, keepdims=True)
    mask = (dot >= 0).astype(jnp.float32)
    d_sq = jnp.sum(d * d, axis=0, keepdims=True)
    x_out = NEG_SLOPE * p + (1.0 - NEG_SLOPE) * (
        mask * p + (1.0 - mask) * (p - (dot / (d_sq + EPS)) * d))
    s = jnp.sqrt(jnp.sum(x_out * x_out, axis=0))

    h = jnp.maximum(bn(params["w1"] @ s, params["g1"], params["b1"]), 0.0)
    h = jnp.maximum(bn(params["w2"] @ h, params["g2"], params["b2"]), 0.0)
    h = params["w3"] @ h + params["bias3"][:, None]
    h = jax.nn.softmax(h / TEMP, axis=0)
    return h.reshape(-1, B, K).transpose(1, 0, 2)


def init_params(key, in_channel=4, out_channel=8, hidden_unit=(8, 8)):
    """Deterministic synthetic parameters, PyTorch [C_out, C_in] weight layout."""
    c0 = out_channel * 2
    dims = [c0] + list(hidden_unit) + [out_channel]   # [16, 8, 8, 8]
    keys = jax.random.split(key, 12)

    def w(k, shape, scale=0.3):
        return scale * jax.random.normal(k, shape, dtype=jnp.float32)

    return dict(
        wf=w(keys[0], (c0, in_channel)),
        wd=w(keys[1], (c0, in_channel)),
        g0=1.0 + 0.1 * jax.random.normal(keys[2], (c0,), jnp.float32),
        b0=0.1 * jax.random.normal(keys[3], (c0,), jnp.float32),
        w1=w(keys[4], (dims[1], dims[0])),
        g1=1.0 + 0.1 * jax.random.normal(keys[5], (dims[1],), jnp.float32),
        b1=0.1 * jax.random.normal(keys[6], (dims[1],), jnp.float32),
        w2=w(keys[7], (dims[2], dims[1])),
        g2=1.0 + 0.1 * jax.random.normal(keys[8], (dims[2],), jnp.float32),
        b2=0.1 * jax.random.normal(keys[9], (dims[2],), jnp.float32),
        w3=w(keys[10], (dims[3], dims[2])),
        bias3=0.1 * jax.random.normal(keys[11], (dims[3],), jnp.float32),
    )


if __name__ == "__main__":
    key = jax.random.PRNGKey(0)
    kx, kp = jax.random.split(key)

    B, C_IN, K = 2, 4, 16
    OUT_CHANNEL = 8
    xyz = jax.random.normal(kx, (B, C_IN, 3, K), dtype=jnp.float32)
    params = init_params(kp, in_channel=C_IN, out_channel=OUT_CHANNEL,
                         hidden_unit=(8, 8))

    out = correlation_net_forward(xyz, params)
    out = jax.block_until_ready(out)

    ref = correlation_net_ref(xyz, params)
    assert out.shape == (B, OUT_CHANNEL, K)
    np.testing.assert_allclose(np.asarray(out), np.asarray(ref), rtol=2e-3, atol=2e-3)
    np.testing.assert_allclose(np.asarray(out.sum(axis=1)), 1.0, rtol=2e-3, atol=2e-3)
    print("KERNEL_OK")
</pallas_src>

<mosaic_0001>
module attributes {stable_mosaic.version = 11 : i64} {
  func.func @kernel(%arg0: memref<3x4x32xf32, #tpu.memory_space<vmem>>, %arg1: memref<32x36xf32, #tpu.memory_space<vmem>>, %arg2: memref<72x1xf32, #tpu.memory_space<vmem>>, %arg3: memref<8x32xf32, #tpu.memory_space<vmem>>) attributes {dimension_semantics = [], scalar_prefetch = 0 : i64, scratch_operands = 0 : i64, tpu.core_type = #tpu.core_type<tc>} {
    %c0 = arith.constant 0 : index
    %c0_0 = arith.constant 0 : index
    %0 = vector.load %arg1[%c0, %c0_0] : memref<32x36xf32, #tpu.memory_space<vmem>>, vector<32x36xf32>
    %c0_1 = arith.constant 0 : index
    %c0_2 = arith.constant 0 : index
    %1 = vector.load %arg2[%c0_1, %c0_2] : memref<72x1xf32, #tpu.memory_space<vmem>>, vector<72x1xf32>
    %2 = vector.extract_strided_slice %0 {offsets = [0, 0], sizes = [32, 4], strides = [1, 1]} : vector<32x36xf32> to vector<32x4xf32>
    %3 = vector.extract_strided_slice %0 {offsets = [0, 4], sizes = [8, 16], strides = [1, 1]} : vector<32x36xf32> to vector<8x16xf32>
    %4 = vector.extract_strided_slice %0 {offsets = [0, 20], sizes = [8, 8], strides = [1, 1]} : vector<32x36xf32> to vector<8x8xf32>
    %5 = vector.extract_strided_slice %0 {offsets = [0, 28], sizes = [8, 8], strides = [1, 1]} : vector<32x36xf32> to vector<8x8xf32>
    %6 = vector.extract_strided_slice %1 {offsets = [0, 0], sizes = [16, 1], strides = [1, 1]} : vector<72x1xf32> to vector<16x1xf32>
    %7 = vector.extract_strided_slice %1 {offsets = [16, 0], sizes = [16, 1], strides = [1, 1]} : vector<72x1xf32> to vector<16x1xf32>
    %8 = vector.extract_strided_slice %1 {offsets = [32, 0], sizes = [8, 1], strides = [1, 1]} : vector<72x1xf32> to vector<8x1xf32>
    %9 = vector.extract_strided_slice %1 {offsets = [40, 0], sizes = [8, 1], strides = [1, 1]} : vector<72x1xf32> to vector<8x1xf32>
    %10 = vector.extract_strided_slice %1 {offsets = [48, 0], sizes = [8, 1], strides = [1, 1]} : vector<72x1xf32> to vector<8x1xf32>
    %11 = vector.extract_strided_slice %1 {offsets = [56, 0], sizes = [8, 1], strides = [1, 1]} : vector<72x1xf32> to vector<8x1xf32>
    %12 = vector.extract_strided_slice %1 {offsets = [64, 0], sizes = [8, 1], strides = [1, 1]} : vector<72x1xf32> to vector<8x1xf32>
    %c0_3 = arith.constant 0 : index
    %c0_4 = arith.constant 0 : index
    %c0_5 = arith.constant 0 : index
    %13 = vector.load %arg0[%c0_3, %c0_4, %c0_5] : memref<3x4x32xf32, #tpu.memory_space<vmem>>, vector<1x4x32xf32>
    %14 = vector.shape_cast %13 : vector<1x4x32xf32> to vector<4x32xf32>
    %cst = arith.constant dense<0.000000e+00> : vector<32x32xf32>
    %15 = tpu.matmul %2, %14, %cst {dimension_numbers = #tpu.dot_dimension_numbers<[1], [0], [0], [1], [0, 0, 1, 1], [], []>} : vector<32x4xf32>, vector<4x32xf32>, vector<32x32xf32> -> vector<32x32xf32>
    %c1 = arith.constant 1 : index
    %c0_6 = arith.constant 0 : index
    %c0_7 = arith.constant 0 : index
    %16 = vector.load %arg0[%c1, %c0_6, %c0_7] : memref<3x4x32xf32, #tpu.memory_space<vmem>>, vector<1x4x32xf32>
    %17 = vector.shape_cast %16 : vector<1x4x32xf32> to vector<4x32xf32>
    %cst_8 = arith.constant dense<0.000000e+00> : vector<32x32xf32>
    %18 = tpu.matmul %2, %17, %cst_8 {dimension_numbers = #tpu.dot_dimension_numbers<[1], [0], [0], [1], [0, 0, 1, 1], [], []>} : vector<32x4xf32>, vector<4x32xf32>, vector<32x32xf32> -> vector<32x32xf32>
    %c2 = arith.constant 2 : index
    %c0_9 = arith.constant 0 : index
    %c0_10 = arith.constant 0 : index
    %19 = vector.load %arg0[%c2, %c0_9, %c0_10] : memref<3x4x32xf32, #tpu.memory_space<vmem>>, vector<1x4x32xf32>
    %20 = vector.shape_cast %19 : vector<1x4x32xf32> to vector<4x32xf32>
    %cst_11 = arith.constant dense<0.000000e+00> : vector<32x32xf32>
    %21 = tpu.matmul %2, %20, %cst_11 {dimension_numbers = #tpu.dot_dimension_numbers<[1], [0], [0], [1], [0, 0, 1, 1], [], []>} : vector<32x4xf32>, vector<4x32xf32>, vector<32x32xf32> -> vector<32x32xf32>
    %22 = vector.extract_strided_slice %15 {offsets = [0, 0], sizes = [16, 32], strides = [1, 1]} : vector<32x32xf32> to vector<16x32xf32>
    %23 = vector.extract_strided_slice %15 {offsets = [16, 0], sizes = [16, 32], strides = [1, 1]} : vector<32x32xf32> to vector<16x32xf32>
    %24 = vector.extract_strided_slice %18 {offsets = [0, 0], sizes = [16, 32], strides = [1, 1]} : vector<32x32xf32> to vector<16x32xf32>
    %25 = vector.extract_strided_slice %18 {offsets = [16, 0], sizes = [16, 32], strides = [1, 1]} : vector<32x32xf32> to vector<16x32xf32>
    %26 = vector.extract_strided_slice %21 {offsets = [0, 0], sizes = [16, 32], strides = [1, 1]} : vector<32x32xf32> to vector<16x32xf32>
    %27 = vector.extract_strided_slice %21 {offsets = [16, 0], sizes = [16, 32], strides = [1, 1]} : vector<32x32xf32> to vector<16x32xf32>
    %28 = arith.mulf %22, %22 : vector<16x32xf32>
    %29 = arith.mulf %24, %24 : vector<16x32xf32>
    %30 = arith.addf %28, %29 : vector<16x32xf32>
    %31 = arith.mulf %26, %26 : vector<16x32xf32>
    %32 = arith.addf %30, %31 : vector<16x32xf32>
    %33 = math.sqrt %32 : vector<16x32xf32>
    %cst_12 = arith.constant 9.99999997E-7 : f32
    %34 = vector.broadcast %cst_12 : f32 to vector<16x32xf32>
    %35 = arith.addf %33, %34 : vector<16x32xf32>
    %cst_13 = arith.constant dense<0.000000e+00> : vector<16xf32>
    %36 = vector.multi_reduction <add>, %35, %cst_13 [1] : vector<16x32xf32> to vector<16xf32>
    %37 = vector.shape_cast %36 : vector<16xf32> to vector<16x1xf32>
    %cst_14 = arith.constant 3.200000e+01 : f32
    %38 = vector.broadcast %cst_14 : f32 to vector<16x1xf32>
    %39 = arith.divf %37, %38 : vector<16x1xf32>
    %40 = vector.broadcast %39 : vector<16x1xf32> to vector<16x32xf32>
    %41 = arith.subf %35, %40 : vector<16x32xf32>
    %42 = vector.broadcast %39 : vector<16x1xf32> to vector<16x32xf32>
    %43 = arith.subf %35, %42 : vector<16x32xf32>
    %44 = arith.mulf %41, %43 : vector<16x32xf32>
    %cst_15 = arith.constant dense<0.000000e+00> : vector<16xf32>
    %45 = vector.multi_reduction <add>, %44, %cst_15 [1] : vector<16x32xf32> to vector<16xf32>
    %46 = vector.shape_cast %45 : vector<16xf32> to vector<16x1xf32>
    %cst_16 = arith.constant 3.200000e+01 : f32
    %47 = vector.broadcast %cst_16 : f32 to vector<16x1xf32>
    %48 = arith.divf %46, %47 : vector<16x1xf32>
    %49 = vector.broadcast %39 : vector<16x1xf32> to vector<16x32xf32>
    %50 = arith.subf %35, %49 : vector<16x32xf32>
    %cst_17 = arith.constant 9.99999974E-6 : f32
    %51 = vector.broadcast %cst_17 : f32 to vector<16x1xf32>
    %52 = arith.addf %48, %51 : vector<16x1xf32>
    %53 = math.rsqrt %52 : vector<16x1xf32>
    %54 = vector.broadcast %53 : vector<16x1xf32> to vector<16x32xf32>
    %55 = arith.mulf %50, %54 : vector<16x32xf32>
    %56 = vector.broadcast %6 : vector<16x1xf32> to vector<16x32xf32>
    %57 = arith.mulf %55, %56 : vector<16x32xf32>
    %58 = vector.broadcast %7 : vector<16x1xf32> to vector<16x32xf32>
    %59 = arith.addf %57, %58 : vector<16x32xf32>
    %60 = tpu.reciprocal %35 {approx = true} : vector<16x32xf32> -> vector<16x32xf32>
    %61 = arith.mulf %59, %60 : vector<16x32xf32>
    %62 = arith.mulf %22, %61 : vector<16x32xf32>
    %63 = arith.mulf %24, %61 : vector<16x32xf32>
    %64 = arith.mulf %26, %61 : vector<16x32xf32>
    %65 = arith.mulf %62, %23 : vector<16x32xf32>
    %66 = arith.mulf %63, %25 : vector<16x32xf32>
    %67 = arith.addf %65, %66 : vector<16x32xf32>
    %68 = arith.mulf %64, %27 : vector<16x32xf32>
    %69 = arith.addf %67, %68 : vector<16x32xf32>
    %70 = arith.mulf %23, %23 : vector<16x32xf32>
    %71 = arith.mulf %25, %25 : vector<16x32xf32>
    %72 = arith.addf %70, %71 : vector<16x32xf32>
    %73 = arith.mulf %27, %27 : vector<16x32xf32>
    %74 = arith.addf %72, %73 : vector<16x32xf32>
    %cst_18 = arith.constant 8.000000e-01 : f32
    %75 = vector.broadcast %cst_18 : f32 to vector<16x32xf32>
    %76 = arith.mulf %75, %69 : vector<16x32xf32>
    %cst_19 = arith.constant 9.99999997E-7 : f32
    %77 = vector.broadcast %cst_19 : f32 to vector<16x32xf32>
    %78 = arith.addf %74, %77 : vector<16x32xf32>
    %79 = tpu.reciprocal %78 {approx = true} : vector<16x32xf32> -> vector<16x32xf32>
    %80 = arith.mulf %76, %79 : vector<16x32xf32>
    %cst_20 = arith.constant 0.000000e+00 : f32
    %81 = vector.broadcast %cst_20 : f32 to vector<16x32xf32>
    %82 = arith.cmpf olt, %69, %81 : vector<16x32xf32>
    %cst_21 = arith.constant 0.000000e+00 : f32
    %83 = vector.broadcast %cst_21 : f32 to vector<16x32xf32>
    %84 = arith.select %82, %80, %83 : vector<16x32xi1>, vector<16x32xf32>
    %85 = arith.mulf %84, %23 : vector<16x32xf32>
    %86 = arith.subf %62, %85 : vector<16x32xf32>
    %87 = arith.mulf %84, %25 : vector<16x32xf32>
    %88 = arith.subf %63, %87 : vector<16x32xf32>
    %89 = arith.mulf %84, %27 : vector<16x32xf32>
    %90 = arith.subf %64, %89 : vector<16x32xf32>
    %91 = arith.mulf %86, %86 : vector<16x32xf32>
    %92 = arith.mulf %88, %88 : vector<16x32xf32>
    %93 = arith.addf %91, %92 : vector<16x32xf32>
    %94 = arith.mulf %90, %90 : vector<16x32xf32>
    %95 = arith.addf %93, %94 : vector<16x32xf32>
    %96 = math.sqrt %95 : vector<16x32xf32>
    %cst_22 = arith.constant dense<0.000000e+00> : vector<8x32xf32>
    %97 = tpu.matmul %3, %96, %cst_22 {dimension_numbers = #tpu.dot_dimension_numbers<[1], [0], [0], [1], [0, 0, 1, 1], [], []>} : vector<8x16xf32>, vector<16x32xf32>, vector<8x32xf32> -> vector<8x32xf32>
    %cst_23 = arith.constant dense<0.000000e+00> : vector<8xf32>
    %98 = vector.multi_reduction <add>, %97, %cst_23 [1] : vector<8x32xf32> to vector<8xf32>
    %99 = vector.shape_cast %98 : vector<8xf32> to vector<8x1xf32>
    %cst_24 = arith.constant 3.200000e+01 : f32
    %100 = vector.broadcast %cst_24 : f32 to vector<8x1xf32>
    %101 = arith.divf %99, %100 : vector<8x1xf32>
    %102 = vector.broadcast %101 : vector<8x1xf32> to vector<8x32xf32>
    %103 = arith.subf %97, %102 : vector<8x32xf32>
    %104 = vector.broadcast %101 : vector<8x1xf32> to vector<8x32xf32>
    %105 = arith.subf %97, %104 : vector<8x32xf32>
    %106 = arith.mulf %103, %105 : vector<8x32xf32>
    %cst_25 = arith.constant dense<0.000000e+00> : vector<8xf32>
    %107 = vector.multi_reduction <add>, %106, %cst_25 [1] : vector<8x32xf32> to vector<8xf32>
    %108 = vector.shape_cast %107 : vector<8xf32> to vector<8x1xf32>
    %cst_26 = arith.constant 3.200000e+01 : f32
    %109 = vector.broadcast %cst_26 : f32 to vector<8x1xf32>
    %110 = arith.divf %108, %109 : vector<8x1xf32>
    %111 = vector.broadcast %101 : vector<8x1xf32> to vector<8x32xf32>
    %112 = arith.subf %97, %111 : vector<8x32xf32>
    %cst_27 = arith.constant 9.99999974E-6 : f32
    %113 = vector.broadcast %cst_27 : f32 to vector<8x1xf32>
    %114 = arith.addf %110, %113 : vector<8x1xf32>
    %115 = math.rsqrt %114 : vector<8x1xf32>
    %116 = vector.broadcast %115 : vector<8x1xf32> to vector<8x32xf32>
    %117 = arith.mulf %112, %116 : vector<8x32xf32>
    %118 = vector.broadcast %8 : vector<8x1xf32> to vector<8x32xf32>
    %119 = arith.mulf %117, %118 : vector<8x32xf32>
    %120 = vector.broadcast %9 : vector<8x1xf32> to vector<8x32xf32>
    %121 = arith.addf %119, %120 : vector<8x32xf32>
    %cst_28 = arith.constant 0.000000e+00 : f32
    %122 = vector.broadcast %cst_28 : f32 to vector<8x32xf32>
    %123 = arith.maximumf %121, %122 : vector<8x32xf32>
    %cst_29 = arith.constant dense<0.000000e+00> : vector<8x32xf32>
    %124 = tpu.matmul %4, %123, %cst_29 {dimension_numbers = #tpu.dot_dimension_numbers<[1], [0], [0], [1], [0, 0, 1, 1], [], []>} : vector<8x8xf32>, vector<8x32xf32>, vector<8x32xf32> -> vector<8x32xf32>
    %cst_30 = arith.constant dense<0.000000e+00> : vector<8xf32>
    %125 = vector.multi_reduction <add>, %124, %cst_30 [1] : vector<8x32xf32> to vector<8xf32>
    %126 = vector.shape_cast %125 : vector<8xf32> to vector<8x1xf32>
    %cst_31 = arith.constant 3.200000e+01 : f32
    %127 = vector.broadcast %cst_31 : f32 to vector<8x1xf32>
    %128 = arith.divf %126, %127 : vector<8x1xf32>
    %129 = vector.broadcast %128 : vector<8x1xf32> to vector<8x32xf32>
    %130 = arith.subf %124, %129 : vector<8x32xf32>
    %131 = vector.broadcast %128 : vector<8x1xf32> to vector<8x32xf32>
    %132 = arith.subf %124, %131 : vector<8x32xf32>
    %133 = arith.mulf %130, %132 : vector<8x32xf32>
    %cst_32 = arith.constant dense<0.000000e+00> : vector<8xf32>
    %134 = vector.multi_reduction <add>, %133, %cst_32 [1] : vector<8x32xf32> to vector<8xf32>
    %135 = vector.shape_cast %134 : vector<8xf32> to vector<8x1xf32>
    %cst_33 = arith.constant 3.200000e+01 : f32
    %136 = vector.broadcast %cst_33 : f32 to vector<8x1xf32>
    %137 = arith.divf %135, %136 : vector<8x1xf32>
    %138 = vector.broadcast %128 : vector<8x1xf32> to vector<8x32xf32>
    %139 = arith.subf %124, %138 : vector<8x32xf32>
    %cst_34 = arith.constant 9.99999974E-6 : f32
    %140 = vector.broadcast %cst_34 : f32 to vector<8x1xf32>
    %141 = arith.addf %137, %140 : vector<8x1xf32>
    %142 = math.rsqrt %141 : vector<8x1xf32>
    %143 = vector.broadcast %142 : vector<8x1xf32> to vector<8x32xf32>
    %144 = arith.mulf %139, %143 : vector<8x32xf32>
    %145 = vector.broadcast %10 : vector<8x1xf32> to vector<8x32xf32>
    %146 = arith.mulf %144, %145 : vector<8x32xf32>
    %147 = vector.broadcast %11 : vector<8x1xf32> to vector<8x32xf32>
    %148 = arith.addf %146, %147 : vector<8x32xf32>
    %cst_35 = arith.constant 0.000000e+00 : f32
    %149 = vector.broadcast %cst_35 : f32 to vector<8x32xf32>
    %150 = arith.maximumf %148, %149 : vector<8x32xf32>
    %cst_36 = arith.constant dense<0.000000e+00> : vector<8x32xf32>
    %151 = tpu.matmul %5, %150, %cst_36 {dimension_numbers = #tpu.dot_dimension_numbers<[1], [0], [0], [1], [0, 0, 1, 1], [], []>} : vector<8x8xf32>, vector<8x32xf32>, vector<8x32xf32> -> vector<8x32xf32>
    %152 = vector.broadcast %12 : vector<8x1xf32> to vector<8x32xf32>
    %153 = arith.addf %151, %152 : vector<8x32xf32>
    %cst_37 = arith.constant dense<0xFF800000> : vector<32xf32>
    %154 = vector.multi_reduction <maximumf>, %153, %cst_37 [0] : vector<8x32xf32> to vector<32xf32>
    %155 = vector.shape_cast %154 : vector<32xf32> to vector<1x32xf32>
    %156 = vector.broadcast %155 : vector<1x32xf32> to vector<8x32xf32>
    %157 = arith.subf %153, %156 : vector<8x32xf32>
    %158 = math.exp %157 : vector<8x32xf32>
    %cst_38 = arith.constant dense<0.000000e+00> : vector<32xf32>
    %159 = vector.multi_reduction <add>, %158, %cst_38 [0] : vector<8x32xf32> to vector<32xf32>
    %160 = vector.shape_cast %159 : vector<32xf32> to vector<1x32xf32>
    %161 = tpu.reciprocal %160 {approx = true} : vector<1x32xf32> -> vector<1x32xf32>
    %162 = vector.broadcast %161 : vector<1x32xf32> to vector<8x32xf32>
    %163 = arith.mulf %158, %162 : vector<8x32xf32>
    %c0_39 = arith.constant 0 : index
    %c0_40 = arith.constant 0 : index
    %164 = vector.load %arg3[%c0_39, %c0_40] : memref<8x32xf32, #tpu.memory_space<vmem>>, vector<8x32xf32>
    tpu.vector_store %arg3[%c0_39, %c0_40], %163 {strides = array<i32>} : memref<8x32xf32, #tpu.memory_space<vmem>>, vector<8x32xf32>,
    return
  }
}

</mosaic_0001>

<bundles_post_ra>
// kernel: tpu_custom_call.1
= control target key start
LH: loop header
LB: loop body
LE: loop exit
PB: predicated region body
PF: predicated region fallthrough
CT: control target
= control target key end

     0   :  { %vm42_vm0 = vcmask 1043456   ;;  %vm29_vm1 = vcmask 31744   ;;  %s814_s0 = inlined_call_operand.vmem [shape: f32[3,4,32], index: 0, kind: input, shape index: {}]   ;;  %s815_s1 = inlined_call_operand.vmem [shape: f32[32,36], index: 1, kind: input, shape index: {}]   ;;  %s816_s2 = inlined_call_operand.vmem [shape: f32[72,1], index: 2, kind: input, shape index: {}]   ;;  %s817_s3 = inlined_call_operand.hbm [shape: f32[8,32], index: 3, kind: output, shape index: {}]  }
   0x1   :  { %v539_v0 = vld [vmem:[%s814_s0 + $0x8] sm:$0xf]  ;;  %v645_v1 = vld [vmem:[%s815_s1] sm:$0xff] }
   0x2   :  { %540 = vmatpush.msk.msra.mxu2 %vm42_vm0, %v539_v0  ;;  %v28_v2 = vld [vmem:[%s814_s0] sm:$0xf]  ;;  %v533_v3 = vld [vmem:[%s814_s0 + $0x4] sm:$0xf] }
   0x3   :  { %8 = vsyncpa [#allocation3], 0  ;;  %541 = vmatmul.msk.f32.vlgmr.msra.gmra.mxu2 %vm29_vm1, %v645_v1  ;;  %528 = vmatpush.msk.msra.mxu0 %vm42_vm0, %v28_v2  ;;  %v16_v4 = vld [vmem:[%s815_s1 + $0x8] sm:$0xff]  ;;  %vm179_vm5 = vcmask 261120   ;;  %v613_v45 = vmov 32.0   ;;  %v17_v48 = vld [vmem:[%s815_s1 + $0x10] sm:$0xff] }
   0x4   :  { %534 = vmatpush.msk.msra.mxu1 %vm42_vm0, %v533_v3  ;;  %529 = vmatmul.msk.f32.vlgmr.msra.gmra.mxu0 %vm29_vm1, %v645_v1  ;;  %v22_v49 = vld [vmem:[%s816_s2 + $0x18] sm:$0xff]  ;;  %v614_v50 = vmov 0   ;;  %v23_v55 = vld [vmem:[%s816_s2 + $0x20] sm:$0xff]  ;;  %v24_v2 = vld [vmem:[%s816_s2 + $0x28] sm:$0xff]  ;;  %s615_s7 = smov 124   ;;  %s616_s10 = smov 108  }
   0x5   :  { %535 = vmatmul.msk.f32.vlgmr.msra.gmra.mxu1 %vm29_vm1, %v645_v1  ;;  %555 = vset.pattern.permute.xlu0 %v614_v50  ;;  %v18_v52 = vld [vmem:[%s815_s1 + $0x18] sm:$0xff]  ;;  %v20_v3 = vld [vmem:[%s816_s2 + $0x8] sm:$0xff]  ;;  %s617_s13 = smov 100   ;;  %s519_s21 = sshll.u32 %s817_s3, 4  ;;  %s520_s21 = int_to_ptr.hbm [resolvable:$true] %s519_s21 }
   0x6   :  { %556 = vset.pattern.permute.xlu1 %v614_v50  ;;  %554 = vset.pattern.permute.xlu2 %v614_v50 }
   0x7   :  { %238 = vperm.xlu2 %554, %v20_v3  }
   0xb   :  { %542 = vmatmul.msk.f32.gmra.mxu2 %vm29_vm1, %v16_v4 }
   0xc   :  { %530 = vmatmul.msk.f32.gmra.mxu0 %vm29_vm1, %v16_v4 }
   0xd   :  { %536 = vmatmul.msk.f32.gmra.mxu1 %vm29_vm1, %v16_v4 }
  0x13   :  { %543 = vmatmul.msk.f32.gmra.mxu2 %vm29_vm1, %v17_v48 }
  0x14   :  { %531 = vmatmul.msk.f32.gmra.mxu0 %vm29_vm1, %v17_v48 }
  0x15   :  { %537 = vmatmul.msk.f32.gmra.mxu1 %vm29_vm1, %v17_v48 }
  0x1b   :  { %544 = vmatmul.msk.f32.gmra.mxu2 %vm29_vm1, %v18_v52 }
  0x1c   :  { %532 = vmatmul.msk.f32.gmra.mxu0 %vm29_vm1, %v18_v52 }
  0x1d   :  { %538 = vmatmul.msk.f32.gmra.mxu1 %vm29_vm1, %v18_v52 }
  0x81   :  { %v665_v5 = vpop.f32.mrf.mxu0 }
  0x82   :  { %v143_v6 = vmul.f32 %v665_v5, %v665_v5  ;;  %v669_v7 = vpop.f32.mrf.mxu1 }
  0x83   :  { %v145_v8 = vmul.f32 %v669_v7, %v669_v7 }
  0x85   :  { %v147_v9 = vadd.f32 %v145_v8, %v143_v6  ;;  %v19_v8 = vld [vmem:[%s816_s2] sm:$0xff] }
  0x86   :  { %v673_v10 = vpop.f32.mrf.mxu2  ;;  %233 = vperm.xlu2 %554, %v19_v8  }
  0x87   :  { %v149_v11 = vmul.f32 %v673_v10, %v673_v10 }
  0x89   :  { %v151_v12 = vadd.f32 %v149_v11, %v147_v9  ;;  %v677_v13 = vpop.f32.mrf.mxu0  ;;  %v21_v9 = vld [vmem:[%s816_s2 + $0x10] sm:$0xff] }
  0x8a   :  { %v144_v14 = vmul.f32 %v677_v13, %v677_v13  ;;  %v681_v15 = vpop.f32.mrf.mxu1 }
  0x8b   :  { %557 = vrsqrt.f32 %v151_v12  ;;  %v146_v16 = vmul.f32 %v681_v15, %v681_v15  ;;  %vm160_vm4 = vcmp.eq.f32.partialorder %v151_v12, inf  ;;  %v163_v40 = vand.u32 2147483648, %v151_v12 }
  0x8c   :  { %vm162_vm6 = vcmp.eq.f32.partialorder %v151_v12, 0.0 }
  0x8d   :  { %v148_v17 = vadd.f32 %v146_v16, %v144_v14 }
  0x8e   :  { %v685_v18 = vpop.f32.mrf.mxu2  ;;  %343 = vrot.lane.b32.xlu2 %v645_v1, %s615_s7 }
  0x8f   :  { %v150_v19 = vmul.f32 %v685_v18, %v685_v18 }
  0x91   :  { %v558_v20 = vpop.eup %557  ;;  %v152_v21 = vadd.f32 %v150_v19, %v148_v17 }
  0x92   :  { %v154_v22 = vmul.f32 %v558_v20, %v151_v12 }
  0x93   :  { %559 = vrsqrt.f32 %v152_v21  ;;  %vm172_vm2 = vcmp.eq.f32.partialorder %v152_v21, inf  ;;  %v175_v35 = vand.u32 2147483648, %v152_v21  ;;  %vm174_vm3 = vcmp.eq.f32.partialorder %v152_v21, 0.0 }
  0x94   :  { %v155_v23 = vmul.f32 %v558_v20, %v154_v22  ;;  %561 = vrcp.f32 %v613_v45  ;;  %v744_v22 = vpop.f32.mrf.mxu1 }
  0x96   :  { %v156_v24 = vmul.f32 0.5, %v155_v23 }
  0x98   :  { %v157_v28 = vsub.f32 1.5, %v156_v24 }
  0x99   :  { %v560_v25 = vpop.eup %559 }
  0x9a   :  { %v166_v26 = vmul.f32 %v560_v25, %v152_v21  ;;  %v158_v31 = vmul.f32 %v558_v20, %v157_v28  ;;  %v562_v46 = vpop.eup %561  ;;  %v239_v28 = vpop.permute.xlu2 %238 }
  0x9b   :  { %v187_v47 = vmul.f32 32.0, %v562_v46  ;;  %vm191_vm7 = vweird.f32 %v562_v46 }
  0x9c   :  { %v167_v27 = vmul.f32 %v560_v25, %v166_v26  ;;  %v159_v34 = vmul.f32 %v158_v31, %v151_v12 }
  0x9d   :  { %v188_v51 = vsub.f32 1.0, %v187_v47 }
  0x9e   :  { %v168_v29 = vmul.f32 0.5, %v167_v27  ;;  %v161_v39 = vsel %vm160_vm4, %v151_v12, %v159_v34  ;;  %vm345_vm4 = vcmask 130048  }
  0x9f   :  { %v164_v42 = vsel %vm162_vm6, %v163_v40, %v161_v39  ;;  %v189_v53 = vmul.f32 %v562_v46, %v188_v51 }
  0xa0   :  { %v169_v30 = vsub.f32 1.5, %v168_v29  ;;  %v693_v43 = vadd.f32 1e-06, %v164_v42 }
  0xa1   :  { %v190_v56 = vadd.f32 %v562_v46, %v189_v53 }
  0xa2   :  { %v170_v32 = vmul.f32 %v560_v25, %v169_v30  ;;  %v180_v44 = vsel %vm179_vm5, %v693_v43, 0.0  ;;  %v746_v25 = vpop.f32.mrf.mxu2 }
  0xa3   :  { %v715_v57 = vsel %vm191_vm7, %v562_v46, %v190_v56  ;;  %v281_v47 = vmul.f32 %v746_v25, %v746_v25 }
  0xa4   :  { %v171_v33 = vmul.f32 %v170_v32, %v152_v21 }
  0xa6   :  { %v173_v36 = vsel %vm172_vm2, %v152_v21, %v171_v33  ;;  %v742_v21 = vpop.f32.mrf.mxu0  ;;  %v750_v33 = vpop.f32.mrf.mxu1 }
  0xa7   :  { %v176_v37 = vsel %vm174_vm3, %v175_v35, %v173_v36  ;;  %v275_v35 = vmul.f32 %v742_v21, %v742_v21  ;;  %v277_v36 = vmul.f32 %v744_v22, %v744_v22 }
  0xa8   :  { %v689_v38 = vadd.f32 1e-06, %v176_v37 }
  0xa9   :  { %v279_v46 = vadd.f32 %v277_v36, %v275_v35 }
  0xaa   :  { %v183_v41 = vsel %vm179_vm5, %v689_v38, 0.0  ;;  %v760_v42 = vpop.f32.mrf.mxu2 }
  0xab   :  { %184 = vadd.xlane.f32.xlu0 %v183_v41  ;;  %v278_v41 = vmul.f32 %v750_v33, %v750_v33  ;;  %v282_v51 = vmul.f32 %v760_v42, %v760_v42 }
  0xae   :  { %v748_v32 = vpop.f32.mrf.mxu0 }
  0xaf   :  { %v276_v40 = vmul.f32 %v748_v32, %v748_v32 }
  0xb1   :  { %v280_v50 = vadd.f32 %v278_v41, %v276_v40 }
  0xb3   :  { %181 = vadd.xlane.f32.xlu0 %v180_v44 }
  0xc7   :  { %250 = vperm.xlu0 %555, %v22_v49  }
  0xcf   :  { %392 = vperm.xlu0 %555, %v23_v55   ;;  %v283_v55 = vadd.f32 %v281_v47, %v279_v46 }
  0xd1   :  { %v287_v3 = vadd.f32 1e-06, %v283_v55 }
  0xd7   :  { %398 = vperm.xlu0 %555, %v24_v2  }
  0xe0   :  { %v234_v49 = vpop.permute.xlu2 %233 }
 0x11e   :  { %v185_v54 = vpop.xlane.xlu0 %184 }
 0x11f   :  { %v194_v60 = vmul.f32 %v715_v57, %v185_v54 }
 0x121   :  { %v721_v63 = vsub.f32 %v689_v38, %v194_v60 }
 0x123   :  { %v198_v4 = vmul.f32 %v721_v63, %v721_v63 }
 0x125   :  { %v202_v6 = vsel %vm179_vm5, %v198_v4, 0.0 }
 0x126   :  { %v182_v58 = vpop.xlane.xlu0 %181 }
 0x127   :  { %v193_v59 = vmul.f32 %v715_v57, %v182_v58  ;;  %v284_v58 = vadd.f32 %v282_v51, %v280_v50 }
 0x129   :  { %v195_v61 = vsub.f32 %v693_v43, %v193_v59  ;;  %v288_v4 = vadd.f32 1e-06, %v284_v58 }
 0x12b   :  { %v197_v62 = vmul.f32 %v195_v61, %v195_v61 }
 0x12d   :  { %v199_v0 = vsel %vm179_vm5, %v197_v62, 0.0 }
 0x12e   :  { %200 = vadd.xlane.f32.xlu1 %v199_v0 }
 0x136   :  { %203 = vadd.xlane.f32.xlu1 %v202_v6 }
 0x14f   :  { %245 = vperm.xlu1 %556, %v21_v9  }
 0x1a1   :  { %v201_v11 = vpop.xlane.xlu1 %200 }
 0x1a2   :  { %v205_v12 = vmul.f32 %v201_v11, %v715_v57 }
 0x1a4   :  { %v207_v14 = vadd.f32 1e-05, %v205_v12 }
 0x1a6   :  { %563 = vrsqrt.f32 %v207_v14  ;;  %vm215_vm9 = vweird.f32 %v207_v14 }
 0x1a9   :  { %v204_v16 = vpop.xlane.xlu1 %203 }
 0x1aa   :  { %v206_v17 = vmul.f32 %v204_v16, %v715_v57 }
 0x1ac   :  { %v564_v19 = vpop.eup %563  ;;  %v208_v20 = vadd.f32 1e-05, %v206_v17 }
 0x1ad   :  { %v210_v23 = vmul.f32 %v564_v19, %v207_v14  ;;  %vm216_vm8 = vweird.f32 %v564_v19 }
 0x1ae   :  { %565 = vrsqrt.f32 %v208_v20  ;;  %vm217_vm10 = vmor %vm215_vm9, %vm216_vm8  ;;  %vm225_vm12 = vweird.f32 %v208_v20  ;;  %vm405_vm9 = vcmask 64512  }
 0x1af   :  { %v211_v24 = vmul.f32 %v564_v19, %v210_v23  ;;  %567 = vrcp.f32 %v693_v43 }
 0x1b0   :  { %569 = vrcp.f32 %v689_v38 }
 0x1b1   :  { %v212_v26 = vmul.f32 0.5, %v211_v24  ;;  %571 = vrcp.f32 %v287_v3 }
 0x1b2   :  { %573 = vrcp.f32 %v288_v4 }
 0x1b3   :  { %v213_v27 = vsub.f32 1.5, %v212_v26 }
 0x1b4   :  { %v566_v29 = vpop.eup %565 }
 0x1b5   :  { %v220_v30 = vmul.f32 %v566_v29, %v208_v20  ;;  %v214_v31 = vmul.f32 %v564_v19, %v213_v27  ;;  %vm226_vm11 = vweird.f32 %v566_v29  ;;  %v568_v59 = vpop.eup %567 }
 0x1b6   :  { %vm227_vm13 = vmor %vm225_vm12, %vm226_vm11  ;;  %v570_v2 = vpop.eup %569 }
 0x1b7   :  { %v221_v34 = vmul.f32 %v566_v29, %v220_v30  ;;  %v218_v39 = vsel %vm217_vm10, %v564_v19, %v214_v31  ;;  %v572_v26 = vpop.eup %571 }
 0x1b8   :  { %v229_v45 = vmul.f32 %v218_v39, %v195_v61  ;;  %v251_v61 = vpop.permute.xlu0 %250  ;;  %v574_v27 = vpop.eup %573 }
 0x1b9   :  { %v222_v37 = vmul.f32 0.5, %v221_v34 }
 0x1ba   :  { %v241_v54 = vmul.f32 %v234_v49, %v229_v45 }
 0x1bb   :  { %v223_v44 = vsub.f32 1.5, %v222_v37 }
 0x1bd   :  { %v224_v48 = vmul.f32 %v566_v29, %v223_v44 }
 0x1bf   :  { %v228_v52 = vsel %vm227_vm13, %v566_v29, %v224_v48 }
 0x1c0   :  { %v230_v53 = vmul.f32 %v228_v52, %v721_v63 }
 0x1c1   :  { %v246_v56 = vpop.permute.xlu1 %245 }
 0x1c2   :  { %v242_v60 = vmul.f32 %v239_v28, %v230_v53  ;;  %v253_v43 = vadd.f32 %v246_v56, %v241_v54 }
 0x1c4   :  { %v254_v62 = vadd.f32 %v251_v61, %v242_v60  ;;  %v257_v0 = vmul.f32 %v568_v59, %v253_v43 }
 0x1c6   :  { %v258_v6 = vmul.f32 %v570_v2, %v254_v62  ;;  %v259_v8 = vmul.f32 %v257_v0, %v665_v5  ;;  %v261_v38 = vmul.f32 %v257_v0, %v669_v7  ;;  %v263_v63 = vmul.f32 %v257_v0, %v673_v10 }
 0x1c8   :  { %v265_v9 = vmul.f32 %v259_v8, %v742_v21  ;;  %v267_v11 = vmul.f32 %v261_v38, %v744_v22  ;;  %v260_v12 = vmul.f32 %v258_v6, %v677_v13  ;;  %v262_v14 = vmul.f32 %v258_v6, %v681_v15 }
 0x1c9   :  { %v264_v16 = vmul.f32 %v258_v6, %v685_v18  ;;  %v271_v19 = vmul.f32 %v263_v63, %v746_v25 }
 0x1ca   :  { %v269_v17 = vadd.f32 %v267_v11, %v265_v9  ;;  %v266_v5 = vmul.f32 %v260_v12, %v748_v32  ;;  %v268_v7 = vmul.f32 %v262_v14, %v750_v33  ;;  %v344_v9 = vpop.permute.xlu2 %343 }
 0x1cb   :  { %v272_v23 = vmul.f32 %v264_v16, %v760_v42 }
 0x1cc   :  { %v273_v10 = vadd.f32 %v271_v19, %v269_v17  ;;  %v270_v20 = vadd.f32 %v268_v7, %v266_v5  ;;  %v27_v17 = vld [vmem:[%s816_s2 + $0x40] sm:$0xff] }
 0x1ce   :  { %v285_v24 = vmul.f32 0.8, %v273_v10  ;;  %v274_v13 = vadd.f32 %v272_v23, %v270_v20  ;;  %vm293_vm14 = vcmp.lt.f32.partialorder %v273_v10, 0.0 }
 0x1d0   :  { %v291_v28 = vmul.f32 %v572_v26, %v285_v24  ;;  %v286_v15 = vmul.f32 0.8, %v274_v13  ;;  %vm294_vm15 = vcmp.lt.f32.partialorder %v274_v13, 0.0 }
 0x1d2   :  { %v295_v18 = vsel %vm293_vm14, %v291_v28, 0.0  ;;  %v292_v34 = vmul.f32 %v574_v27, %v286_v15  ;;  %v393_v28 = vpop.permute.xlu0 %392 }
 0x1d3   :  { %v297_v29 = vmul.f32 %v295_v18, %v742_v21  ;;  %v301_v30 = vmul.f32 %v295_v18, %v744_v22  ;;  %v305_v31 = vmul.f32 %v295_v18, %v746_v25 }
 0x1d4   :  { %v296_v39 = vsel %vm294_vm15, %v292_v34, 0.0 }
 0x1d5   :  { %v299_v35 = vsub.f32 %v259_v8, %v297_v29  ;;  %v303_v36 = vsub.f32 %v261_v38, %v301_v30  ;;  %v307_v37 = vsub.f32 %v263_v63, %v305_v31  ;;  %v298_v40 = vmul.f32 %v296_v39, %v748_v32 }
 0x1d6   :  { %v302_v41 = vmul.f32 %v296_v39, %v750_v33  ;;  %v306_v44 = vmul.f32 %v296_v39, %v760_v42 }
 0x1d7   :  { %v309_v45 = vmul.f32 %v299_v35, %v299_v35  ;;  %v311_v46 = vmul.f32 %v303_v36, %v303_v36  ;;  %v300_v47 = vsub.f32 %v260_v12, %v298_v40  ;;  %v315_v49 = vmul.f32 %v307_v37, %v307_v37 }
 0x1d8   :  { %v304_v21 = vsub.f32 %v262_v14, %v302_v41  ;;  %v308_v48 = vsub.f32 %v264_v16, %v306_v44  ;;  %v25_v16 = vld [vmem:[%s816_s2 + $0x30] sm:$0xff] }
 0x1d9   :  { %v313_v22 = vadd.f32 %v311_v46, %v309_v45  ;;  %v310_v25 = vmul.f32 %v300_v47, %v300_v47 }
 0x1da   :  { %v312_v50 = vmul.f32 %v304_v21, %v304_v21  ;;  %v316_v53 = vmul.f32 %v308_v48, %v308_v48  ;;  %v399_v35 = vpop.permute.xlu0 %398  ;;  %v26_v48 = vld [vmem:[%s816_s2 + $0x38] sm:$0xff]  ;;  %s618_s2 = smov [#allocation2]  }
 0x1db   :  { %v317_v51 = vadd.f32 %v315_v49, %v313_v22  ;;  %s517_s18 = sshll.u32 %s618_s2, 4  ;;  %s518_s18 = int_to_ptr.vmem [resolvable:$true] %s517_s18 }
 0x1dc   :  { %v314_v52 = vadd.f32 %v312_v50, %v310_v25 }
 0x1dd   :  { %575 = vrsqrt.f32 %v317_v51  ;;  %vm326_vm1 = vcmp.eq.f32.partialorder %v317_v51, inf  ;;  %v329_v63 = vand.u32 2147483648, %v317_v51  ;;  %vm328_vm3 = vcmp.eq.f32.partialorder %v317_v51, 0.0 }
 0x1de   :  { %v318_v54 = vadd.f32 %v316_v53, %v314_v52 }
 0x1e0   :  { %577 = vrsqrt.f32 %v318_v54  ;;  %vm338_vm0 = vcmp.eq.f32.partialorder %v318_v54, inf  ;;  %v341_v4 = vand.u32 2147483648, %v318_v54  ;;  %vm340_vm2 = vcmp.eq.f32.partialorder %v318_v54, 0.0 }
 0x1e3   :  { %v576_v32 = vpop.eup %575 }
 0x1e4   :  { %v320_v55 = vmul.f32 %v576_v32, %v317_v51 }
 0x1e6   :  { %v578_v33 = vpop.eup %577  ;;  %v321_v56 = vmul.f32 %v576_v32, %v320_v55 }
 0x1e7   :  { %v332_v42 = vmul.f32 %v578_v33, %v318_v54 }
 0x1e8   :  { %v322_v58 = vmul.f32 0.5, %v321_v56 }
 0x1e9   :  { %v333_v59 = vmul.f32 %v578_v33, %v332_v42 }
 0x1ea   :  { %v323_v60 = vsub.f32 1.5, %v322_v58 }
 0x1eb   :  { %v334_v43 = vmul.f32 0.5, %v333_v59 }
 0x1ec   :  { %v324_v61 = vmul.f32 %v576_v32, %v323_v60 }
 0x1ed   :  { %v335_v62 = vsub.f32 1.5, %v334_v43 }
 0x1ee   :  { %v325_v2 = vmul.f32 %v324_v61, %v317_v51 }
 0x1ef   :  { %v336_v0 = vmul.f32 %v578_v33, %v335_v62 }
 0x1f0   :  { %v327_v8 = vsel %vm326_vm1, %v317_v51, %v325_v2 }
 0x1f1   :  { %v337_v3 = vmul.f32 %v336_v0, %v318_v54  ;;  %v330_v11 = vsel %vm328_vm3, %v329_v63, %v327_v8 }
 0x1f3   :  { %v339_v6 = vsel %vm338_vm0, %v318_v54, %v337_v3 }
 0x1f4   :  { %v342_v38 = vsel %vm340_vm2, %v341_v4, %v339_v6 }
 0x1f5   :  { %362 = vmatpush.msra.mxu3 %v342_v38 }
 0x1f7   :  { %363 = vmatpush.msra.mxu3 %v330_v11 }
 0x1f8   :  { %545 = vmatmul.msk.f32.vlgmr.msra.gmra.mxu3 %vm345_vm4, %v344_v9 }
 0x27b   :  { %v365_v12 = vpop.f32.mrf.mxu3 }
 0x27c   :  { %v368_v14 = vsel %vm179_vm5, %v365_v12, 0.0 }
 0x27d   :  { %369 = vadd.xlane.f32.xlu2 %v368_v14 }
 0x295   :  { %403 = vrot.lane.b32.xlu2 %v645_v1, %s616_s10 }
 0x29d   :  { %452 = vperm.xlu2 %554, %v25_v16  }
 0x2a5   :  { %468 = vrot.lane.b32.xlu2 %v645_v1, %s617_s13 }
 0x2ad   :  { %465 = vperm.xlu2 %554, %v27_v17  }
 0x2f0   :  { %v370_v19 = vpop.xlane.xlu2 %369 }
 0x2f1   :  { %v371_v5 = vmul.f32 %v370_v19, %v715_v57 }
 0x2f3   :  { %v372_v7 = vsub.f32 %v365_v12, %v371_v5 }
 0x2f5   :  { %v373_v10 = vmul.f32 %v372_v7, %v372_v7 }
 0x2f7   :  { %v374_v20 = vsel %vm179_vm5, %v373_v10, 0.0 }
 0x2f8   :  { %375 = vadd.xlane.f32.xlu1 %v374_v20  ;;  %v404_v39 = vpop.permute.xlu2 %403 }
 0x300   :  { %v453_v55 = vpop.permute.xlu2 %452 }
 0x308   :  { %v469_v43 = vpop.permute.xlu2 %468 }
 0x36b   :  { %v376_v23 = vpop.xlane.xlu1 %375 }
 0x36c   :  { %v377_v24 = vmul.f32 %v376_v23, %v715_v57 }
 0x36e   :  { %v378_v26 = vadd.f32 1e-05, %v377_v24 }
 0x370   :  { %579 = vrsqrt.f32 %v378_v26  ;;  %vm385_vm7 = vweird.f32 %v378_v26 }
 0x376   :  { %v580_v13 = vpop.eup %579 }
 0x377   :  { %v380_v1 = vmul.f32 %v580_v13, %v378_v26  ;;  %vm386_vm6 = vweird.f32 %v580_v13 }
 0x378   :  { %vm387_vm8 = vmor %vm385_vm7, %vm386_vm6 }
 0x379   :  { %v381_v27 = vmul.f32 %v580_v13, %v380_v1 }
 0x37b   :  { %v382_v15 = vmul.f32 0.5, %v381_v27 }
 0x37d   :  { %v383_v18 = vsub.f32 1.5, %v382_v15 }
 0x37f   :  { %v384_v29 = vmul.f32 %v580_v13, %v383_v18 }
 0x381   :  { %v388_v30 = vsel %vm387_vm8, %v580_v13, %v384_v29 }
 0x382   :  { %v389_v31 = vmul.f32 %v388_v30, %v372_v7 }
 0x384   :  { %v395_v34 = vmul.f32 %v393_v28, %v389_v31 }
 0x386   :  { %v401_v36 = vadd.f32 %v399_v35, %v395_v34 }
 0x388   :  { %v402_v37 = vmax.f32 %v401_v36, 0.0 }
 0x38a   :  { %423 = vmatpush.msrb.mxu3 %v402_v37 }
 0x38b   :  { %546 = vmatmul.msk.f32.vlgmr.msrb.gmra.mxu3 %vm405_vm9, %v404_v39 }
 0x40e   :  { %v425_v40 = vpop.f32.mrf.mxu3 }
 0x40f   :  { %v428_v41 = vsel %vm179_vm5, %v425_v40, 0.0 }
 0x410   :  { %429 = vadd.xlane.f32.xlu0 %v428_v41 }
 0x483   :  { %v430_v44 = vpop.xlane.xlu0 %429 }
 0x484   :  { %v431_v45 = vmul.f32 %v430_v44, %v715_v57 }
 0x486   :  { %v432_v46 = vsub.f32 %v425_v40, %v431_v45 }
 0x488   :  { %v433_v47 = vmul.f32 %v432_v46, %v432_v46 }
 0x48a   :  { %v434_v21 = vsel %vm179_vm5, %v433_v47, 0.0 }
 0x48b   :  { %435 = vadd.xlane.f32.xlu1 %v434_v21 }
 0x4a4   :  { %458 = vperm.xlu1 %556, %v26_v48  }
 0x4fe   :  { %v436_v22 = vpop.xlane.xlu1 %435 }
 0x4ff   :  { %v437_v49 = vmul.f32 %v436_v22, %v715_v57  ;;  %v466_v57 = vpop.permute.xlu2 %465 }
 0x501   :  { %v438_v25 = vadd.f32 1e-05, %v437_v49 }
 0x503   :  { %581 = vrsqrt.f32 %v438_v25  ;;  %vm445_vm11 = vweird.f32 %v438_v25 }
 0x509   :  { %v582_v50 = vpop.eup %581 }
 0x50a   :  { %v440_v51 = vmul.f32 %v582_v50, %v438_v25  ;;  %vm446_vm10 = vweird.f32 %v582_v50 }
 0x50b   :  { %vm447_vm12 = vmor %vm445_vm11, %vm446_vm10 }
 0x50c   :  { %v441_v52 = vmul.f32 %v582_v50, %v440_v51 }
 0x50e   :  { %v442_v53 = vmul.f32 0.5, %v441_v52 }
 0x510   :  { %v443_v54 = vsub.f32 1.5, %v442_v53 }
 0x512   :  { %v444_v32 = vmul.f32 %v582_v50, %v443_v54 }
 0x514   :  { %v448_v33 = vsel %vm447_vm12, %v582_v50, %v444_v32 }
 0x515   :  { %v449_v56 = vmul.f32 %v448_v33, %v432_v46 }
 0x516   :  { %v459_v58 = vpop.permute.xlu1 %458 }
 0x517   :  { %v455_v42 = vmul.f32 %v453_v55, %v449_v56 }
 0x519   :  { %v461_v59 = vadd.f32 %v459_v58, %v455_v42 }
 0x51b   :  { %v462_v60 = vmax.f32 %v461_v59, 0.0 }
 0x51d   :  { %487 = vmatpush.msra.mxu3 %v462_v60 }
 0x51e   :  { %547 = vmatmul.msk.f32.vlgmr.msra.gmra.mxu3 %vm405_vm9, %v469_v43 }
 0x5a1   :  { %v489_v61 = vpop.f32.mrf.mxu3 }
 0x5a2   :  { %v490_v62 = vadd.f32 %v489_v61, %v466_v57 }
 0x5a4   :  { %v492_v0 = vsel %vm179_vm5, %v490_v62, -inf }
 0x5a5   :  { %v493_v2 = vrot.slane %v492_v0, 4 }
 0x5a7   :  { %v494_v3 = vmax.f32 %v492_v0, %v493_v2 }
 0x5a9   :  { %v495_v4 = vrot.slane %v494_v3, 2 }
 0x5ab   :  { %v496_v6 = vmax.f32 %v494_v3, %v495_v4 }
 0x5ad   :  { %v497_v8 = vrot.slane %v496_v6, 1 }
 0x5af   :  { %v498_v38 = vmax.f32 %v496_v6, %v497_v8 }
 0x5b1   :  { %v499_v63 = vsub.f32 %v490_v62, %v498_v38 }
 0x5b3   :  { %v500_v9 = vmul.f32 1.442695, %v499_v63 }
 0x5b5   :  { %583 = vpow2.f32 %v500_v9 }
 0x5bb   :  { %v584_v11 = vpop.eup %583 }
 0x5bc   :  { %v502_v12 = vsel %vm179_vm5, %v584_v11, 0.0 }
 0x5bd   :  { %v503_v14 = vrot.slane %v502_v12, 4 }
 0x5bf   :  { %v504_v16 = vadd.f32 %v503_v14, %v502_v12 }
 0x5c1   :  { %v505_v17 = vrot.slane %v504_v16, 2 }
 0x5c3   :  { %v506_v19 = vadd.f32 %v505_v17, %v504_v16 }
 0x5c5   :  { %v507_v5 = vrot.slane %v506_v19, 1 }
 0x5c7   :  { %v508_v7 = vadd.f32 %v507_v5, %v506_v19 }
 0x5c9   :  { %585 = vrcp.f32 %v508_v7 }
 0x5cf   :  { %v586_v10 = vpop.eup %585 }
 0x5d0   :  { %v510_v20 = vmul.f32 %v586_v10, %v584_v11 }
 0x5d2   :  { %511 = vst.msk [vmem:[#allocation2] sm:$0xff] %vm179_vm5, %v510_v20 }
 0x5d3   :  { %522 = dma.vmem_to_hbm [thread:$0]  %s518_s18, 128, %s520_s21, [#allocation3]  }
 0x5d4   :  { %611 = dma.done.wait [#allocation3], 128  }
 0x5d5   :  { %612 = vsyncadd [#allocation3], 4294967168 }
 0x5d6   :  { %527 = vsyncpa [#allocation3], 1 }

</bundles_post_ra>
